<compile_context>
chip_gen: v7x
topology: tpu7x:2x2x1
jax: 0.10.0
libtpu: 0.0.40
codegen_flags: <defaults>
</compile_context>

<pallas_src>
import jax
import jax.numpy as jnp
from jax.experimental import pallas as pl
from jax.experimental.pallas import tpu as pltpu

_LANE = 128


def _capture_kernel(x_ref, act_ref):
    # The clone: one full-tile copy.  (`return x` needs no kernel work.)
    act_ref[...] = x_ref[...]


def _sublane_multiple(dtype):
    # Sublane packing granularity: 8 for 4-byte, 16 for 2-byte, 32 for 1-byte.
    # TODO(synk): sub-byte dtypes (int4/fp4) would need 64-row packing.
    itemsize = jnp.dtype(dtype).itemsize
    return max(8, 32 // max(itemsize, 1))


def _vmem_budget_bytes():
    """Generation-aware scoped-VMEM cap (leave headroom for compiler scratch)."""
    cap = None
    try:
        info = pltpu.get_tpu_info()
        cap = int(getattr(info, "vmem_capacity_bytes", 0)) or None
    except Exception:
        cap = None
    if cap is None:
        cap = 128 * 1024 * 1024
    if cap <= 64 * 1024 * 1024:
        # v7x-class: 64 MiB physical per TC; don't request all of it.
        return 44 * 1024 * 1024
    # v5e / v6e: 128 MiB physical; 64 MiB scoped is plenty for this kernel.
    return 64 * 1024 * 1024


def _choose_tile_rows(rows, cols, itemsize, sub, target_bytes):
    """Largest divisor of `rows` that is a multiple of `sub` with tile size at
    or under `target_bytes`; prefers >= 2 grid steps.  Returns None when no
    sublane-aligned tiling exists (caller falls back to the padded layout)."""
    max_tile = max(sub, target_bytes // max(cols * itemsize, 1))
    if rows <= max_tile:
        # Whole array fits in one target-sized tile (a full-extent block is
        # legal even if rows is not a multiple of sub).  Split in two when that
        # keeps sublane alignment, so both v7x TensorCores get work.
        if rows % (2 * sub) == 0:
            return rows // 2
        return rows
    best = 0
    t = sub
    while t <= max_tile:
        if rows % t == 0:
            best = t
        t += sub
    return best if best > 0 else None


def _choose_layout(total, sub, itemsize, target_tile_bytes):
    """Pick a lane-dense 2-D packing + tiling for `total` elements.

    Returns (rows, cols, tile_r, pad_total): pad/reshape the flat array to
    `pad_total` elements viewed as (rows, cols) and copy in (tile_r, cols)
    tiles.  pad_total == total whenever a no-padding layout exists.
    """
    # 1) No-padding layout: cols a multiple of 128 that divides `total`.
    candidates = [c for c in range(_LANE, min(total, 2048) + 1, _LANE)
                  if total % c == 0]
    if candidates:
        wide = [c for c in candidates if total // c >= sub]
        cols = max(wide) if wide else max(candidates)
        rows = total // cols
        tile_r = _choose_tile_rows(rows, cols, itemsize, sub, target_tile_bytes)
        if tile_r is not None:
            return rows, cols, tile_r, total

    # 2) Padded layout: fixed lane-dense tile, pad flat array to whole tiles.
    cols = 1024 if total >= 1024 * sub else _LANE
    max_tile_r = max(sub, (target_tile_bytes // (cols * itemsize)) // sub * sub)
    rows_needed = -(-total // cols)
    rows = -(-rows_needed // sub) * sub          # round up to sublane multiple
    tile_r = min(max_tile_r, rows)
    rows = -(-rows // tile_r) * tile_r           # whole number of tiles
    return rows, cols, tile_r, rows * cols


def activation_capture(x, *, min_pallas_bytes=1 << 20, target_tile_bytes=8 << 20):
    """Mimics ActivationCapture.forward.

    Returns (out, activations):
      out         -- the module's return value (the input itself; JAX arrays
                     are immutable, so `return x` needs no copy),
      activations -- the captured clone (separate buffer, same contents).
    """
    orig_shape = x.shape
    total = 1
    for d in orig_shape:
        total *= d
    if total == 0:
        return x, x  # nothing to capture for empty tensors

    itemsize = jnp.dtype(x.dtype).itemsize
    nbytes = total * itemsize
    out = x  # `return x` — zero extra HBM traffic.

    if nbytes < min_pallas_bytes:
        # Tiny-input fast path: kernel dispatch + pipeline prologue dominates,
        # so let XLA emit a fused copy instead.
        return out, jnp.copy(x)

    sub = _sublane_multiple(x.dtype)
    rows, cols, tile_r, pad_total = _choose_layout(
        total, sub, itemsize, target_tile_bytes)
    grid_r = rows // tile_r
    tile_bytes = tile_r * cols * itemsize

    # 1 input + 1 output spec, each double-buffered -> 4 live tiles + headroom.
    vmem_limit = int(min(_vmem_budget_bytes(),
                         max(16 << 20, 4 * tile_bytes + (4 << 20))))

    # NOTE: for a contiguous row-major input these reshapes are free; a
    # strided/transposed producer would make XLA materialize an extra copy.
    x_flat = x.reshape(-1)
    if pad_total != total:
        x_flat = jnp.pad(x_flat, (0, pad_total - total))
    x2d = x_flat.reshape(rows, cols)

    act2d = pl.pallas_call(
        _capture_kernel,
        out_shape=jax.ShapeDtypeStruct((rows, cols), x.dtype),
        grid_spec=pl.GridSpec(
            grid=(grid_r,),
            in_specs=[pl.BlockSpec((tile_r, cols), lambda i: (i, 0))],
            out_specs=pl.BlockSpec((tile_r, cols), lambda i: (i, 0)),
        ),
        compiler_params=pltpu.CompilerParams(
            dimension_semantics=("parallel",),
            vmem_limit_bytes=vmem_limit,
        ),
    )(x2d)

    act_flat = act2d.reshape(-1)
    if pad_total != total:
        act_flat = act_flat[:total]
    activations = act_flat.reshape(orig_shape)
    return out, activations


if __name__ == "__main__":
    key = jax.random.PRNGKey(0)
    x = jax.random.normal(key, (2, 4, 16, 16), dtype=jnp.float32)

    # Force the Pallas path even though the demo tensor is tiny.
    out, activations = activation_capture(x, min_pallas_bytes=0)
    jax.block_until_ready(out)
    jax.block_until_ready(activations)

    assert out.shape == x.shape and out.dtype == x.dtype
    assert activations.shape == x.shape and activations.dtype == x.dtype
    assert bool(jnp.array_equal(out, x))
    assert bool(jnp.array_equal(activations, x))

    # Non-128-divisible element count -> exercises the hardened padded path.
    y = jax.random.normal(jax.random.PRNGKey(1), (3, 5, 7), dtype=jnp.float32)
    out_y, act_y = activation_capture(y, min_pallas_bytes=0)
    jax.block_until_ready(act_y)
    assert act_y.shape == y.shape and bool(jnp.array_equal(act_y, y))
    assert bool(jnp.array_equal(out_y, y))

    # Default call (tiny-input XLA fast path).
    out_z, act_z = activation_capture(x)
    jax.block_until_ready(act_z)
    assert bool(jnp.array_equal(act_z, x)) and bool(jnp.array_equal(out_z, x))

    print("KERNEL_OK")
</pallas_src>

<mosaic_0001>
module attributes {stable_mosaic.version = 11 : i64} {
  func.func @_capture_kernel(%arg0: i32, %arg1: memref<8x256xf32, #tpu.memory_space<vmem>>, %arg2: memref<8x256xf32, #tpu.memory_space<vmem>>) attributes {dimension_semantics = [#tpu.dimension_semantics<parallel>], iteration_bounds = array<i64: 1>, scalar_prefetch = 0 : i64, scratch_operands = 0 : i64, tpu.core_type = #tpu.core_type<tc>, window_params = [{transform_indices = @transform_0, window_bounds = array<i64: 8, 256>}, {transform_indices = @transform_1, window_bounds = array<i64: 8, 256>}]} {
    %c0 = arith.constant 0 : index
    %c0_0 = arith.constant 0 : index
    %0 = vector.load %arg1[%c0, %c0_0] : memref<8x256xf32, #tpu.memory_space<vmem>>, vector<8x256xf32>
    %c0_1 = arith.constant 0 : index
    %c0_2 = arith.constant 0 : index
    %1 = vector.load %arg2[%c0_1, %c0_2] : memref<8x256xf32, #tpu.memory_space<vmem>>, vector<8x256xf32>
    tpu.vector_store %arg2[%c0_1, %c0_2], %0 {strides = array<i32>} : memref<8x256xf32, #tpu.memory_space<vmem>>, vector<8x256xf32>,
    return
  }
  func.func @transform_0(%arg0: i32) -> (i32, i32) {
    %c0_i32 = arith.constant 0 : i32
    %c0_i32_0 = arith.constant 0 : i32
    return %arg0, %c0_i32 : i32, i32
  }
  func.func @transform_1(%arg0: i32) -> (i32, i32) {
    %c0_i32 = arith.constant 0 : i32
    %c0_i32_0 = arith.constant 0 : i32
    return %arg0, %c0_i32 : i32, i32
  }
}

</mosaic_0001>

<bundles_post_ra>
// kernel: tpu_custom_call.1
= control target key start
LH: loop header
LB: loop body
LE: loop exit
PB: predicated region body
PF: predicated region fallthrough
CT: control target
= control target key end

     0   :  { %6 = vsyncpa [#allocation3], 0  ;;  %s126_s0 = inlined_call_operand.hbm [shape: f32[8,256], index: 0, kind: input, shape index: {}]   ;;  %s127_s1 = inlined_call_operand.hbm [shape: f32[8,256], index: 1, kind: output, shape index: {}]  }
   0x1   :  { %7 = vsyncpa [#allocation4], 0  ;;  %s90_s6 = smov [#allocation2]   ;;  %s42_s10 = scalar_lea.hbm %s126_s0, 256 }
   0x2   :  { %s14_s7 = sshll.u32 %s90_s6, 4  ;;  %p43_p0 = scmp.ne.s32.totalorder %s126_s0, %s42_s10  ;;  %s15_s7 = int_to_ptr.vmem [resolvable:$true] %s14_s7 }
   0x3   :  { %p46_p1 = scmp.lt.u32.totalorder %s42_s10, %s126_s0 }
   0x5   :  { %p48_p2 = pnand %p46_p1, %p43_p0 }
   0x7   :  { %51 = shalt.err (!%p48_p2)
}
   0x8   :  { %s52_s15 = scalar_lea.vmem %s15_s7, 256  ;;  %p57_p4 = scmp.lt.s32.totalorder %s15_s7, %s15_s7 }
   0x9   :  { %p53_p3 = scmp.ne.s32.totalorder %s15_s7, %s52_s15  ;;  %p58_p5 = scmp.lt.s32.totalorder %s52_s15, %s52_s15 }
   0xb   :  { %p59_p6 = por %p58_p5, %p57_p4 }
   0xd   :  { %p60_p7 = pnand %p59_p6, %p53_p3 }
   0xf   :  { %63 = shalt.err (!%p60_p7)
}
  0x10   :  { %17 = dma.hbm_to_vmem [thread:$0]  %s126_s0, 256, %s15_s7, [#allocation3]  }
  0x11   :  { %86 = dma.done.wait [#allocation3], 256  }
  0x12   :  { %87 = vsyncadd [#allocation3], 4294967040  ;;  %s91_s18 = smov [#allocation5]   ;;  %v21_v0 = vld [vmem:[#allocation2] sm:$0xff]  ;;  %v22_v1 = vld [vmem:[#allocation2 + $0x8] sm:$0xff] }
  0x13   :  { %s31_s19 = sshll.u32 %s91_s18, 4  ;;  %23 = vst [vmem:[#allocation5] sm:$0xff] %v21_v0  ;;  %24 = vst [vmem:[#allocation5 + $0x8] sm:$0xff] %v22_v1  ;;  %s32_s19 = int_to_ptr.vmem [resolvable:$true] %s31_s19 }
  0x14   :  { %s64_s20 = scalar_lea.vmem %s32_s19, 256  ;;  %p69_p9 = scmp.lt.s32.totalorder %s32_s19, %s32_s19 }
  0x15   :  { %p65_p8 = scmp.ne.s32.totalorder %s32_s19, %s64_s20  ;;  %p70_p10 = scmp.lt.s32.totalorder %s64_s20, %s64_s20 }
  0x17   :  { %p71_p11 = por %p70_p10, %p69_p9 }
  0x19   :  { %p72_p12 = pnand %p71_p11, %p65_p8 }
  0x1b   :  { %75 = shalt.err (!%p72_p12)
}
  0x1c   :  { %s76_s0 = scalar_lea.hbm %s127_s1, 256 }
  0x1d   :  { %p77_p13 = scmp.ne.s32.totalorder %s127_s1, %s76_s0  ;;  %p80_p0 = scmp.lt.u32.totalorder %s76_s0, %s127_s1 }
  0x1f   :  { %p82_p1 = pnand %p80_p0, %p77_p13 }
  0x21   :  { %85 = shalt.err (!%p82_p1)
}
  0x22   :  { %34 = dma.vmem_to_hbm [thread:$0]  %s32_s19, 256, %s127_s1, [#allocation4]  }
  0x23   :  { %88 = dma.done.wait [#allocation4], 256  }
  0x24   :  { %89 = vsyncadd [#allocation4], 4294967040 }
  0x25   :  { %38 = vsyncpa [#allocation3], 1 }
  0x26   :  { %39 = vsyncpa [#allocation4], 1 }

</bundles_post_ra>
